<compile_context>
chip_gen: v5e
topology: v5e:2x2
jax: 0.10.0
libtpu: 0.0.40
codegen_flags: <defaults>
</compile_context>

<pallas_src>
import functools

import jax
import jax.numpy as jnp
from jax.experimental import pallas as pl
from jax.experimental.pallas import tpu as pltpu

BN_EPS = 1e-5
HIDDEN = 128  # fixed by the module definition

_VMEM_LIMIT = 32 * 1024 * 1024         # explicit scoped-VMEM limit (safe on v5e/v6e/v7x)
_FUSED_VMEM_BUDGET = 24 * 1024 * 1024  # fused working-set cap (v7x = 64 MiB physical)


def _round_up(x, m):
    return (x + m - 1) // m * m


# --------------------------------------------------------------------------
# Fused single-kernel path: whole forward pass, h never leaves VMEM.
# --------------------------------------------------------------------------
def _fused_mlp_kernel(x_ref, w1_ref, b1_ref, gamma_ref, beta_ref, w2_ref, b2_ref,
                      o_ref, *, batch):
    h = jnp.dot(x_ref[...], w1_ref[...], preferred_element_type=jnp.float32)
    h = jnp.maximum(h + b1_ref[...], 0.0)                       # (B_pad, H) f32
    b_pad = h.shape[0]

    if b_pad != batch:
        valid = jax.lax.broadcasted_iota(jnp.int32, (b_pad, 1), 0) < batch
        h = jnp.where(valid, h, 0.0)

    inv_b = 1.0 / batch
    mean = jnp.sum(h, axis=0, keepdims=True) * inv_b            # (1, H)
    c = h - mean
    if b_pad != batch:
        c = jnp.where(valid, c, 0.0)
    var = jnp.sum(c * c, axis=0, keepdims=True) * inv_b         # biased (training mode)

    inv_std = jax.lax.rsqrt(var + BN_EPS)
    scale = gamma_ref[...] * inv_std                            # (1, H)
    shift = beta_ref[...] - mean * scale                        # (1, H)

    hn = h * scale + shift                                      # f32 VPU
    o_ref[...] = jnp.dot(hn.astype(w2_ref.dtype), w2_ref[...],
                         preferred_element_type=jnp.float32) + b2_ref[...]


def _fused_vmem_bytes(b_pad, k, h, n_pad, itm):
    # Rough estimate: double-buffered inputs/outputs + f32 temporaries for h.
    weights = 2 * ((k * h + h * n_pad) * itm + (3 * h + n_pad) * 4)
    stream = 2 * b_pad * k * itm + 2 * b_pad * n_pad * 4
    temps = 4 * b_pad * h * 4
    return weights + stream + temps


def _mlp_fused(x, w1, b1, gamma, beta, w2, b2, matmul_dtype):
    B, K = x.shape
    H = w1.shape[1]
    N = w2.shape[1]
    B_pad = _round_up(B, 8)
    N_pad = _round_up(N, 128)
    itm = jnp.dtype(matmul_dtype).itemsize

    x_p = jnp.pad(x, ((0, B_pad - B), (0, 0))).astype(matmul_dtype)
    w1_c = jnp.asarray(w1, matmul_dtype)
    b1_r = jnp.asarray(b1, jnp.float32).reshape(1, H)
    g_r = jnp.asarray(gamma, jnp.float32).reshape(1, H)
    be_r = jnp.asarray(beta, jnp.float32).reshape(1, H)
    w2_p = jnp.pad(jnp.asarray(w2, jnp.float32),
                   ((0, 0), (0, N_pad - N))).astype(matmul_dtype)
    b2_r = jnp.pad(jnp.asarray(b2, jnp.float32).reshape(1, N),
                   ((0, 0), (0, N_pad - N)))

    cost = pl.CostEstimate(
        flops=2 * B_pad * K * H + 2 * B_pad * H * N_pad + 8 * B_pad * H,
        transcendentals=H,
        bytes_accessed=(B_pad * K * itm + (K * H + H * N_pad) * itm
                        + (3 * H + N_pad) * 4 + B_pad * N_pad * 4))

    out = pl.pallas_call(
        functools.partial(_fused_mlp_kernel, batch=B),
        grid=(1,),
        in_specs=[
            pl.BlockSpec((B_pad, K), lambda i: (0, 0)),    # x
            pl.BlockSpec((K, H), lambda i: (0, 0)),        # W1
            pl.BlockSpec((1, H), lambda i: (0, 0)),        # b1
            pl.BlockSpec((1, H), lambda i: (0, 0)),        # gamma
            pl.BlockSpec((1, H), lambda i: (0, 0)),        # beta
            pl.BlockSpec((H, N_pad), lambda i: (0, 0)),    # W2
            pl.BlockSpec((1, N_pad), lambda i: (0, 0)),    # b2
        ],
        out_specs=pl.BlockSpec((B_pad, N_pad), lambda i: (0, 0)),
        out_shape=jax.ShapeDtypeStruct((B_pad, N_pad), jnp.float32),
        compiler_params=pltpu.CompilerParams(
            dimension_semantics=("arbitrary",),
            vmem_limit_bytes=_VMEM_LIMIT),
        cost_estimate=cost,
    )(x_p, w1_c, b1_r, g_r, be_r, w2_p, b2_r)

    return out[:B, :N]


# --------------------------------------------------------------------------
# Two-pass streaming fallback (very large batches)
# --------------------------------------------------------------------------
def _linear_relu_stats_kernel(x_ref, w1_ref, b1_ref, k_ref, h_ref, s_ref, ss_ref):
    # x: (TB, K)  W1: (K, H)  b1/k: (1, H);  k = relu(b1) so zero-padded batch
    # rows (h == relu(b1)) contribute exactly 0 to the shifted statistics.
    h = jnp.dot(x_ref[...], w1_ref[...], preferred_element_type=jnp.float32)
    h = jnp.maximum(h + b1_ref[...], 0.0)                       # (TB, H) f32
    h_ref[...] = h.astype(h_ref.dtype)                          # bf16 store -> half HBM

    d = h - k_ref[...]                                          # shifted stats
    H = h.shape[1]
    s_ref[...] = jnp.sum(d, axis=0, keepdims=True).reshape(1, 1, H)
    ss_ref[...] = jnp.sum(d * d, axis=0, keepdims=True).reshape(1, 1, H)


def _linear_kernel(h_ref, w2_ref, b2_ref, o_ref):
    # BN affine already folded into W2'/b2' -> pure DMA + MXU.
    o_ref[...] = jnp.dot(h_ref[...], w2_ref[...],
                         preferred_element_type=jnp.float32) + b2_ref[...]


def _mlp_two_pass(x, w1, b1, gamma, beta, w2, b2, block_b, matmul_dtype):
    B, K = x.shape
    H = w1.shape[1]
    N = w2.shape[1]

    TB = min(block_b, B)
    # Multiple of 256 feeds the 2x256^2 MXU (v6e/v7x) in full M passes and is a
    # multiple of v5e's native 128; fall back to 8-row alignment for tiny B.
    TB = _round_up(TB, 256) if TB >= 256 else _round_up(TB, 8)
    B_pad = _round_up(B, TB)
    N_pad = _round_up(N, 128)
    n_blocks = B_pad // TB
    itm = jnp.dtype(matmul_dtype).itemsize

    x_p = jnp.pad(x, ((0, B_pad - B), (0, 0))).astype(matmul_dtype)
    w1_c = jnp.asarray(w1, matmul_dtype)
    b1_r = jnp.asarray(b1, jnp.float32).reshape(1, H)
    k_r = jnp.maximum(b1_r, 0.0)                                # shift = relu(b1)
    w2_f32 = jnp.pad(jnp.asarray(w2, jnp.float32), ((0, 0), (0, N_pad - N)))
    b2_r = jnp.pad(jnp.asarray(b2, jnp.float32).reshape(1, N),
                   ((0, 0), (0, N_pad - N)))

    parallel = pltpu.CompilerParams(dimension_semantics=("parallel",),
                                    vmem_limit_bytes=_VMEM_LIMIT)

    # ---- Pass 1: h + per-block shifted stats --------------------------------
    cost1 = pl.CostEstimate(
        flops=2 * B_pad * K * H + 6 * B_pad * H,
        transcendentals=0,
        bytes_accessed=(B_pad * K * itm + K * H * itm + 2 * H * 4
                        + B_pad * H * itm + 2 * n_blocks * H * 4))
    h, s_blk, ss_blk = pl.pallas_call(
        _linear_relu_stats_kernel,
        grid=(n_blocks,),
        in_specs=[
            pl.BlockSpec((TB, K), lambda i: (i, 0)),       # x tile (pipelined)
            pl.BlockSpec((K, H), lambda i: (0, 0)),        # W1 resident
            pl.BlockSpec((1, H), lambda i: (0, 0)),        # b1 resident
            pl.BlockSpec((1, H), lambda i: (0, 0)),        # k = relu(b1) resident
        ],
        out_specs=[
            pl.BlockSpec((TB, H), lambda i: (i, 0)),       # h tile (matmul dtype)
            pl.BlockSpec((1, 1, H), lambda i: (i, 0, 0)),  # per-block sum(d)
            pl.BlockSpec((1, 1, H), lambda i: (i, 0, 0)),  # per-block sum(d^2)
        ],
        out_shape=[
            jax.ShapeDtypeStruct((B_pad, H), matmul_dtype),
            jax.ShapeDtypeStruct((n_blocks, 1, H), jnp.float32),
            jax.ShapeDtypeStruct((n_blocks, 1, H), jnp.float32),
        ],
        compiler_params=parallel,
        cost_estimate=cost1,
    )(x_p, w1_c, b1_r, k_r)

    # ---- Global batch stats -> BN folded into W2'/b2' (tiny, pure JAX) ------
    S = jnp.sum(s_blk, axis=(0, 1))                             # (H,)
    SS = jnp.sum(ss_blk, axis=(0, 1))                           # (H,)
    k = k_r.reshape(H)
    dmean = S / B
    mean = k + dmean
    var = jnp.maximum(SS / B - dmean * dmean, 0.0)              # biased variance
    inv_std = jax.lax.rsqrt(var + BN_EPS)
    g = jnp.asarray(gamma, jnp.float32).reshape(H)
    be = jnp.asarray(beta, jnp.float32).reshape(H)
    scale = g * inv_std
    shift = be - mean * scale
    w2_fold = (w2_f32 * scale[:, None]).astype(matmul_dtype)    # (H, N_pad)
    b2_fold = b2_r + shift[None, :] @ w2_f32                    # (1, N_pad) f32

    # ---- Pass 2: out = h @ W2' + b2' ----------------------------------------
    cost2 = pl.CostEstimate(
        flops=2 * B_pad * H * N_pad,
        transcendentals=0,
        bytes_accessed=(B_pad * H * itm + H * N_pad * itm + N_pad * 4
                        + B_pad * N_pad * 4))
    out = pl.pallas_call(
        _linear_kernel,
        grid=(n_blocks,),
        in_specs=[
            pl.BlockSpec((TB, H), lambda i: (i, 0)),       # h tile (pipelined)
            pl.BlockSpec((H, N_pad), lambda i: (0, 0)),    # W2' resident
            pl.BlockSpec((1, N_pad), lambda i: (0, 0)),    # b2' resident
        ],
        out_specs=pl.BlockSpec((TB, N_pad), lambda i: (i, 0)),
        out_shape=jax.ShapeDtypeStruct((B_pad, N_pad), jnp.float32),
        compiler_params=parallel,
        cost_estimate=cost2,
    )(h, w2_fold, b2_fold)

    return out[:B, :N]


# --------------------------------------------------------------------------
# Public wrapper
# --------------------------------------------------------------------------
def mlp_forward(x, w1, b1, gamma, beta, w2, b2, *,
                block_b=512, matmul_dtype=jnp.bfloat16, force_two_pass=False):
    """Training-mode forward of Mlp. Weights stored pre-transposed as (in, out).

    Uses a fully fused single pallas_call whenever the working set fits a
    conservative 24 MiB VMEM budget (safe on v7x's 64 MiB); otherwise streams
    the batch in `block_b`-row tiles through a two-pass pipeline.
    """
    B, K = x.shape
    H = w1.shape[1]
    N = w2.shape[1]
    assert w1.shape == (K, H) and w2.shape == (H, N)

    B_pad = _round_up(B, 8)
    N_pad = _round_up(N, 128)
    itm = jnp.dtype(matmul_dtype).itemsize

    if (not force_two_pass
            and _fused_vmem_bytes(B_pad, K, H, N_pad, itm) <= _FUSED_VMEM_BUDGET):
        return _mlp_fused(x, w1, b1, gamma, beta, w2, b2, matmul_dtype)
    return _mlp_two_pass(x, w1, b1, gamma, beta, w2, b2, block_b, matmul_dtype)


# --------------------------------------------------------------------------
# Parameter init + pure-JAX reference
# --------------------------------------------------------------------------
def init_params(key, input_dim, hidden_dim, features_dim):
    """Deterministic parameter init (PyTorch-like uniform ranges, fixed key)."""
    k1, k2, k3, k4 = jax.random.split(key, 4)
    lim1 = 1.0 / jnp.sqrt(input_dim)
    lim2 = 1.0 / jnp.sqrt(hidden_dim)
    # Pre-transposed (in, out) so kernels compute x @ W directly.
    w1 = jax.random.uniform(k1, (input_dim, hidden_dim), jnp.float32, -lim1, lim1)
    b1 = jax.random.uniform(k2, (1, hidden_dim), jnp.float32, -lim1, lim1)
    gamma = jnp.ones((1, hidden_dim), jnp.float32)
    beta = jnp.zeros((1, hidden_dim), jnp.float32)
    w2 = jax.random.uniform(k3, (hidden_dim, features_dim), jnp.float32, -lim2, lim2)
    b2 = jax.random.uniform(k4, (1, features_dim), jnp.float32, -lim2, lim2)
    return w1, b1, gamma, beta, w2, b2


def mlp_reference(x, w1, b1, gamma, beta, w2, b2):
    """Pure-JAX reference of the training-mode forward pass."""
    h = jnp.maximum(x @ w1 + b1, 0.0)
    mean = jnp.mean(h, axis=0, keepdims=True)
    var = jnp.mean((h - mean) ** 2, axis=0, keepdims=True)
    h = (h - mean) / jnp.sqrt(var + BN_EPS) * gamma + beta
    return h @ w2 + b2


if __name__ == "__main__":
    B = 70            # batch != 5 -> training-mode BatchNorm path; not a multiple
                      # of the tile size -> exercises batch padding handling
    input_dim = 32
    features_dim = 16

    key = jax.random.PRNGKey(0)
    kx, kp = jax.random.split(key)
    x = jax.random.normal(kx, (B, input_dim), jnp.float32)
    params = init_params(kp, input_dim, HIDDEN, features_dim)

    ref = mlp_reference(x, *params)

    # Fused single-kernel path (the default at these shapes).
    out_f32 = jax.block_until_ready(
        mlp_forward(x, *params, matmul_dtype=jnp.float32))
    assert out_f32.shape == (B, features_dim)
    assert jnp.allclose(out_f32, ref, atol=1e-3, rtol=1e-3), "fused f32 mismatch"

    out_bf16 = jax.block_until_ready(
        mlp_forward(x, *params, matmul_dtype=jnp.bfloat16))
    assert out_bf16.shape == (B, features_dim)
    assert jnp.allclose(out_bf16, ref, atol=1e-1, rtol=1e-1), "fused bf16 mismatch"

    # Two-pass streaming fallback (large-batch path), forced here at a small
    # tile (block_b=32) purely to validate the multi-block grid + padding; the
    # production default tile is 512 rows.
    out_tp_f32 = jax.block_until_ready(
        mlp_forward(x, *params, matmul_dtype=jnp.float32,
                    force_two_pass=True, block_b=32))
    assert out_tp_f32.shape == (B, features_dim)
    assert jnp.allclose(out_tp_f32, ref, atol=1e-3, rtol=1e-3), "two-pass f32 mismatch"

    out_tp_bf16 = jax.block_until_ready(
        mlp_forward(x, *params, matmul_dtype=jnp.bfloat16,
                    force_two_pass=True, block_b=32))
    assert out_tp_bf16.shape == (B, features_dim)
    assert jnp.allclose(out_tp_bf16, ref, atol=1e-1, rtol=1e-1), "two-pass bf16 mismatch"

    print("KERNEL_OK")
</pallas_src>

<mosaic_0001>
module attributes {stable_mosaic.version = 11 : i64} {
  func.func @_fused_mlp_kernel(%arg0: i32, %arg1: memref<72x32xf32, #tpu.memory_space<vmem>>, %arg2: memref<32x128xf32, #tpu.memory_space<vmem>>, %arg3: memref<1x128xf32, #tpu.memory_space<vmem>>, %arg4: memref<1x128xf32, #tpu.memory_space<vmem>>, %arg5: memref<1x128xf32, #tpu.memory_space<vmem>>, %arg6: memref<128x128xf32, #tpu.memory_space<vmem>>, %arg7: memref<1x128xf32, #tpu.memory_space<vmem>>, %arg8: memref<72x128xf32, #tpu.memory_space<vmem>>) attributes {dimension_semantics = [#tpu.dimension_semantics<arbitrary>], iteration_bounds = array<i64: 1>, scalar_prefetch = 0 : i64, scratch_operands = 0 : i64, tpu.core_type = #tpu.core_type<tc>, window_params = [{pipeline_mode = #tpu.pipeline_mode<synchronous>, transform_indices = @transform_0, window_bounds = array<i64: 72, 32>}, {pipeline_mode = #tpu.pipeline_mode<synchronous>, transform_indices = @transform_1, window_bounds = array<i64: 32, 128>}, {pipeline_mode = #tpu.pipeline_mode<synchronous>, transform_indices = @transform_2, window_bounds = array<i64: 1, 128>}, {pipeline_mode = #tpu.pipeline_mode<synchronous>, transform_indices = @transform_3, window_bounds = array<i64: 1, 128>}, {pipeline_mode = #tpu.pipeline_mode<synchronous>, transform_indices = @transform_4, window_bounds = array<i64: 1, 128>}, {pipeline_mode = #tpu.pipeline_mode<synchronous>, transform_indices = @transform_5, window_bounds = array<i64: 128, 128>}, {pipeline_mode = #tpu.pipeline_mode<synchronous>, transform_indices = @transform_6, window_bounds = array<i64: 1, 128>}, {pipeline_mode = #tpu.pipeline_mode<synchronous>, transform_indices = @transform_7, window_bounds = array<i64: 72, 128>}]} {
    %c0 = arith.constant 0 : index
    %c0_0 = arith.constant 0 : index
    %0 = vector.load %arg1[%c0, %c0_0] : memref<72x32xf32, #tpu.memory_space<vmem>>, vector<72x32xf32>
    %c0_1 = arith.constant 0 : index
    %c0_2 = arith.constant 0 : index
    %1 = vector.load %arg2[%c0_1, %c0_2] : memref<32x128xf32, #tpu.memory_space<vmem>>, vector<32x128xf32>
    %cst = arith.constant dense<0.000000e+00> : vector<72x128xf32>
    %2 = tpu.matmul %0, %1, %cst {dimension_numbers = #tpu.dot_dimension_numbers<[1], [0], [0], [1], [0, 0, 1, 1], [], []>} : vector<72x32xf32>, vector<32x128xf32>, vector<72x128xf32> -> vector<72x128xf32>
    %c0_3 = arith.constant 0 : index
    %c0_4 = arith.constant 0 : index
    %3 = vector.load %arg3[%c0_3, %c0_4] : memref<1x128xf32, #tpu.memory_space<vmem>>, vector<1x128xf32>
    %4 = vector.broadcast %3 : vector<1x128xf32> to vector<72x128xf32>
    %5 = arith.addf %2, %4 : vector<72x128xf32>
    %cst_5 = arith.constant 0.000000e+00 : f32
    %6 = vector.broadcast %cst_5 : f32 to vector<72x128xf32>
    %7 = arith.maximumf %5, %6 : vector<72x128xf32>
    %8 = tpu.iota {dimensions = array<i32: 0>} : vector<72x1xi32>
    %c70_i32 = arith.constant 70 : i32
    %9 = vector.broadcast %c70_i32 : i32 to vector<72x1xi32>
    %10 = arith.cmpi slt, %8, %9 : vector<72x1xi32>
    %cst_6 = arith.constant 0.000000e+00 : f32
    %11 = vector.shape_cast %10 : vector<72x1xi1> to vector<72x1xi1>
    %12 = vector.broadcast %11 : vector<72x1xi1> to vector<72x128xi1>
    %13 = vector.broadcast %cst_6 : f32 to vector<72x128xf32>
    %14 = arith.select %12, %7, %13 : vector<72x128xi1>, vector<72x128xf32>
    %cst_7 = arith.constant dense<0.000000e+00> : vector<128xf32>
    %15 = vector.multi_reduction <add>, %14, %cst_7 [0] : vector<72x128xf32> to vector<128xf32>
    %16 = vector.shape_cast %15 : vector<128xf32> to vector<1x128xf32>
    %cst_8 = arith.constant 0.0142857144 : f32
    %17 = vector.broadcast %cst_8 : f32 to vector<1x128xf32>
    %18 = arith.mulf %16, %17 : vector<1x128xf32>
    %19 = vector.broadcast %18 : vector<1x128xf32> to vector<72x128xf32>
    %20 = arith.subf %14, %19 : vector<72x128xf32>
    %cst_9 = arith.constant 0.000000e+00 : f32
    %21 = vector.shape_cast %10 : vector<72x1xi1> to vector<72x1xi1>
    %22 = vector.broadcast %21 : vector<72x1xi1> to vector<72x128xi1>
    %23 = vector.broadcast %cst_9 : f32 to vector<72x128xf32>
    %24 = arith.select %22, %20, %23 : vector<72x128xi1>, vector<72x128xf32>
    %25 = arith.mulf %24, %24 : vector<72x128xf32>
    %cst_10 = arith.constant dense<0.000000e+00> : vector<128xf32>
    %26 = vector.multi_reduction <add>, %25, %cst_10 [0] : vector<72x128xf32> to vector<128xf32>
    %27 = vector.shape_cast %26 : vector<128xf32> to vector<1x128xf32>
    %cst_11 = arith.constant 0.0142857144 : f32
    %28 = vector.broadcast %cst_11 : f32 to vector<1x128xf32>
    %29 = arith.mulf %27, %28 : vector<1x128xf32>
    %cst_12 = arith.constant 9.99999974E-6 : f32
    %30 = vector.broadcast %cst_12 : f32 to vector<1x128xf32>
    %31 = arith.addf %29, %30 : vector<1x128xf32>
    %32 = math.rsqrt %31 : vector<1x128xf32>
    %c0_13 = arith.constant 0 : index
    %c0_14 = arith.constant 0 : index
    %33 = vector.load %arg4[%c0_13, %c0_14] : memref<1x128xf32, #tpu.memory_space<vmem>>, vector<1x128xf32>
    %34 = arith.mulf %33, %32 : vector<1x128xf32>
    %c0_15 = arith.constant 0 : index
    %c0_16 = arith.constant 0 : index
    %35 = vector.load %arg5[%c0_15, %c0_16] : memref<1x128xf32, #tpu.memory_space<vmem>>, vector<1x128xf32>
    %36 = arith.mulf %18, %34 : vector<1x128xf32>
    %37 = arith.subf %35, %36 : vector<1x128xf32>
    %38 = vector.broadcast %34 : vector<1x128xf32> to vector<72x128xf32>
    %39 = arith.mulf %14, %38 : vector<72x128xf32>
    %40 = vector.broadcast %37 : vector<1x128xf32> to vector<72x128xf32>
    %41 = arith.addf %39, %40 : vector<72x128xf32>
    %c0_17 = arith.constant 0 : index
    %c0_18 = arith.constant 0 : index
    %42 = vector.load %arg6[%c0_17, %c0_18] : memref<128x128xf32, #tpu.memory_space<vmem>>, vector<128x128xf32>
    %cst_19 = arith.constant dense<0.000000e+00> : vector<72x128xf32>
    %43 = tpu.matmul %41, %42, %cst_19 {dimension_numbers = #tpu.dot_dimension_numbers<[1], [0], [0], [1], [0, 0, 1, 1], [], []>} : vector<72x128xf32>, vector<128x128xf32>, vector<72x128xf32> -> vector<72x128xf32>
    %c0_20 = arith.constant 0 : index
    %c0_21 = arith.constant 0 : index
    %44 = vector.load %arg7[%c0_20, %c0_21] : memref<1x128xf32, #tpu.memory_space<vmem>>, vector<1x128xf32>
    %45 = vector.broadcast %44 : vector<1x128xf32> to vector<72x128xf32>
    %46 = arith.addf %43, %45 : vector<72x128xf32>
    %c0_22 = arith.constant 0 : index
    %c0_23 = arith.constant 0 : index
    %47 = vector.load %arg8[%c0_22, %c0_23] : memref<72x128xf32, #tpu.memory_space<vmem>>, vector<72x128xf32>
    tpu.vector_store %arg8[%c0_22, %c0_23], %46 {strides = array<i32>} : memref<72x128xf32, #tpu.memory_space<vmem>>, vector<72x128xf32>,
    return
  }
  func.func @transform_0(%arg0: i32) -> (i32, i32) {
    %c0_i32 = arith.constant 0 : i32
    %c0_i32_0 = arith.constant 0 : i32
    %c0_i32_1 = arith.constant 0 : i32
    return %c0_i32, %c0_i32_0 : i32, i32
  }
  func.func @transform_1(%arg0: i32) -> (i32, i32) {
    %c0_i32 = arith.constant 0 : i32
    %c0_i32_0 = arith.constant 0 : i32
    %c0_i32_1 = arith.constant 0 : i32
    return %c0_i32, %c0_i32_0 : i32, i32
  }
  func.func @transform_2(%arg0: i32) -> (i32, i32) {
    %c0_i32 = arith.constant 0 : i32
    %c0_i32_0 = arith.constant 0 : i32
    %c0_i32_1 = arith.constant 0 : i32
    return %c0_i32, %c0_i32_0 : i32, i32
  }
  func.func @transform_3(%arg0: i32) -> (i32, i32) {
    %c0_i32 = arith.constant 0 : i32
    %c0_i32_0 = arith.constant 0 : i32
    %c0_i32_1 = arith.constant 0 : i32
    return %c0_i32, %c0_i32_0 : i32, i32
  }
  func.func @transform_4(%arg0: i32) -> (i32, i32) {
    %c0_i32 = arith.constant 0 : i32
    %c0_i32_0 = arith.constant 0 : i32
    %c0_i32_1 = arith.constant 0 : i32
    return %c0_i32, %c0_i32_0 : i32, i32
  }
  func.func @transform_5(%arg0: i32) -> (i32, i32) {
    %c0_i32 = arith.constant 0 : i32
    %c0_i32_0 = arith.constant 0 : i32
    %c0_i32_1 = arith.constant 0 : i32
    return %c0_i32, %c0_i32_0 : i32, i32
  }
  func.func @transform_6(%arg0: i32) -> (i32, i32) {
    %c0_i32 = arith.constant 0 : i32
    %c0_i32_0 = arith.constant 0 : i32
    %c0_i32_1 = arith.constant 0 : i32
    return %c0_i32, %c0_i32_0 : i32, i32
  }
  func.func @transform_7(%arg0: i32) -> (i32, i32) {
    %c0_i32 = arith.constant 0 : i32
    %c0_i32_0 = arith.constant 0 : i32
    %c0_i32_1 = arith.constant 0 : i32
    return %c0_i32, %c0_i32_0 : i32, i32
  }
}

</mosaic_0001>

<bundles_post_ra>
// kernel: tpu_custom_call.1
= control target key start
LH: loop header
LB: loop body
LE: loop exit
PB: predicated region body
PF: predicated region fallthrough
CT: control target
= control target key end

     0   :  { %12 = vsyncpa [#allocation3], 0  ;;  %s661_s0 = inlined_call_operand.vmem [shape: f32[72,32], index: 0, kind: input, shape index: {}]   ;;  %s662_s1 = inlined_call_operand.vmem [shape: f32[32,128], index: 1, kind: input, shape index: {}]   ;;  %s663_s2 = inlined_call_operand.vmem [shape: f32[1,128], index: 2, kind: input, shape index: {}]   ;;  %s664_s3 = inlined_call_operand.vmem [shape: f32[1,128], index: 3, kind: input, shape index: {}]   ;;  %s665_s4 = inlined_call_operand.vmem [shape: f32[1,128], index: 4, kind: input, shape index: {}]   ;;  %s666_s5 = inlined_call_operand.hbm [shape: f32[128,128], index: 5, kind: input, shape index: {}]   ;;  %s667_s6 = inlined_call_operand.vmem [shape: f32[1,128], index: 6, kind: input, shape index: {}]   ;;  %s668_s7 = inlined_call_operand.hbm [shape: f32[72,128], index: 7, kind: output, shape index: {}]  }
   0x1   :  { %13 = vsyncpa [#allocation4], 0  ;;  %s28_s26 = sshll.u32 %s666_s5, 4  ;;  %s481_s27 = smov [#allocation2]   ;;  %s29_s26 = int_to_ptr.hbm [resolvable:$true] %s28_s26 }
   0x2   :  { %s30_s28 = sshll.u32 %s481_s27, 4  ;;  %s482_s29 = smov 128   ;;  %s31_s28 = int_to_ptr.vmem [resolvable:$true] %s30_s28 }
   0x3   :  { %s483_s30 = smov 8  }
   0x4   :  { %36 = dma.hbm_to_vmem [thread:$0]  %s29_s26, 2048, %s31_s28, [#allocation3], %s482_s29, %s482_s29, %s483_s30  }
   0x5   :  { %477 = dma.done.wait [#allocation3], 2048  }
   0x6   :  { %478 = vsyncadd [#allocation3], 4294965248  ;;  %v55_v0 = vld [vmem:[%s662_s1 + $0x18] sm:$0xff]  ;;  %v54_v1 = vld [vmem:[%s662_s1 + $0x10] sm:$0xff]  ;;  %vm60_vm0 = vcmask 261120   ;;  %v141_v26 = vlaneseq  ;;  %s363_s17 = sshll.u32 %s668_s7, 4  ;;  %s364_s17 = int_to_ptr.hbm [resolvable:$true] %s363_s17 }
   0x7   :  { %100 = vmatpush.msra.mxu0 %v55_v0  ;;  %385 = vmatpush.msra.mxu3 %v55_v0  ;;  %v53_v2 = vld [vmem:[%s662_s1 + $0x8] sm:$0xff]  ;;  %v52_v3 = vld [vmem:[%s662_s1] sm:$0xff]  ;;  %v49_v5 = vld [vmem:[%s661_s0 + $0x30] sm:$0xff] }
   0x8   :  { %v43_v4 = vld [vmem:[%s661_s0] sm:$0xff]  ;;  %v44_v6 = vld [vmem:[%s661_s0 + $0x8] sm:$0xff]  ;;  %v50_v7 = vld [vmem:[%s661_s0 + $0x38] sm:$0xff]  ;;  %v142_v33 = vshrl.u32 %v141_v26, 7 }
   0x9   :  { %101 = vmatpush.msra.mxu0 %v54_v1  ;;  %386 = vmatpush.msra.mxu3 %v54_v1  ;;  %v45_v8 = vld [vmem:[%s661_s0 + $0x10] sm:$0xff]  ;;  %v51_v9 = vld [vmem:[%s661_s0 + $0x40] sm:$0xff]  ;;  %v46_v10 = vld [vmem:[%s661_s0 + $0x18] sm:$0xff] }
   0xa   :  { %v47_v11 = vld [vmem:[%s661_s0 + $0x20] sm:$0xff]  ;;  %v48_v12 = vld [vmem:[%s661_s0 + $0x28] sm:$0xff]  ;;  %v596_v41 = vadd.s32 64, %v142_v33 }
   0xb   :  { %102 = vmatpush.msra.mxu0 %v53_v2  ;;  %387 = vmatpush.msra.mxu3 %v53_v2  ;;  %v425_v18 = vld [vmem:[%s663_s2] ss:$0 sm:$0xff]  ;;  %v299_v2 = vld [vmem:[#allocation2 + $0x78] sm:$0xff] }
   0xc   :  { %vm159_vm1 = vcmp.lt.s32.totalorder %v596_v41, 70  ;;  %304 = vmatpush.msra.mxu1 %v299_v2  ;;  %389 = vmatpush.msra.mxu2 %v299_v2  ;;  %v292_v33 = vld [vmem:[#allocation2 + $0x40] sm:$0xff] }
   0xd   :  { %103 = vmatpush.msra.mxu0 %v52_v3  ;;  %388 = vmatpush.msra.mxu3 %v52_v3 }
   0xe   :  { %376 = vmatmul.msk.f32.vlgmr.msra.gmra.mxu0 %vm60_vm0, %v43_v4  ;;  %382 = vmatmul.msk.f32.vlgmr.msra.gmra.mxu3 %vm60_vm0, %v49_v5 }
   0xf   :  { %390 = vmatpush.msrb.mxu3 %v299_v2  ;;  %v257_v2 = vld [vmem:[%s665_s4] sm:$0x1] }
  0x16   :  { %377 = vmatmul.msk.f32.gmra.mxu0 %vm60_vm0, %v44_v6  ;;  %383 = vmatmul.msk.f32.gmra.mxu3 %vm60_vm0, %v50_v7  ;;  %v298_v6 = vld [vmem:[#allocation2 + $0x70] sm:$0xff] }
  0x17   :  { %305 = vmatpush.msra.mxu1 %v298_v6  ;;  %391 = vmatpush.msra.mxu2 %v298_v6 }
  0x18   :  { %392 = vmatpush.msrb.mxu3 %v298_v6 }
  0x1e   :  { %378 = vmatmul.msk.f32.gmra.mxu0 %vm60_vm0, %v45_v8  ;;  %384 = vmatmul.msk.f32.gmra.mxu3 %vm60_vm0, %v51_v9 }
  0x26   :  { %379 = vmatmul.msk.f32.gmra.mxu0 %vm60_vm0, %v46_v10  ;;  %v297_v10 = vld [vmem:[#allocation2 + $0x68] sm:$0xff] }
  0x27   :  { %306 = vmatpush.msra.mxu1 %v297_v10  ;;  %393 = vmatpush.msra.mxu2 %v297_v10 }
  0x28   :  { %394 = vmatpush.msrb.mxu3 %v297_v10 }
  0x2e   :  { %380 = vmatmul.msk.f32.gmra.mxu0 %vm60_vm0, %v47_v11 }
  0x36   :  { %381 = vmatmul.msk.f32.gmra.mxu0 %vm60_vm0, %v48_v12 }
  0x8b   :  { %v105_v13 = vpop.f32.mrf.mxu0 }
  0x8c   :  { %v106_v21 = vadd.f32 %v425_v18, %v105_v13 }
  0x8e   :  { %v584_v27 = vmax.f32 %v106_v21, 0.0 }
  0x91   :  { %v123_v16 = vpop.f32.mrf.mxu3 }
  0x92   :  { %v124_v39 = vadd.f32 %v425_v18, %v123_v16 }
  0x93   :  { %v108_v14 = vpop.f32.mrf.mxu0 }
  0x94   :  { %v109_v20 = vadd.f32 %v425_v18, %v108_v14  ;;  %v601_v46 = vmax.f32 %v124_v39, 0.0  ;;  %v296_v14 = vld [vmem:[#allocation2 + $0x60] sm:$0xff] }
  0x95   :  { %307 = vmatpush.msra.mxu1 %v296_v14  ;;  %395 = vmatpush.msra.mxu2 %v296_v14 }
  0x96   :  { %v582_v24 = vmax.f32 %v109_v20, 0.0  ;;  %396 = vmatpush.msrb.mxu3 %v296_v14 }
  0x98   :  { %v187_v30 = vadd.f32 %v582_v24, %v584_v27 }
  0x99   :  { %v126_v19 = vpop.f32.mrf.mxu3 }
  0x9a   :  { %v127_v43 = vadd.f32 %v425_v18, %v126_v19  ;;  %v295_v19 = vld [vmem:[#allocation2 + $0x58] sm:$0xff] }
  0x9b   :  { %v111_v15 = vpop.f32.mrf.mxu0  ;;  %308 = vmatpush.msra.mxu1 %v295_v19  ;;  %397 = vmatpush.msra.mxu2 %v295_v19 }
  0x9c   :  { %v112_v22 = vadd.f32 %v425_v18, %v111_v15  ;;  %v605_v48 = vmax.f32 %v127_v43, 0.0  ;;  %398 = vmatpush.msrb.mxu3 %v295_v19 }
  0x9e   :  { %v586_v28 = vmax.f32 %v112_v22, 0.0  ;;  %v294_v22 = vld [vmem:[#allocation2 + $0x50] sm:$0xff] }
  0x9f   :  { %309 = vmatpush.msra.mxu1 %v294_v22  ;;  %399 = vmatpush.msra.mxu2 %v294_v22 }
  0xa0   :  { %v188_v34 = vadd.f32 %v187_v30, %v586_v28  ;;  %400 = vmatpush.msrb.mxu3 %v294_v22 }
  0xa1   :  { %v129_v32 = vpop.f32.mrf.mxu3 }
  0xa2   :  { %v130_v37 = vadd.f32 %v425_v18, %v129_v32 }
  0xa3   :  { %v114_v17 = vpop.f32.mrf.mxu0 }
  0xa4   :  { %v115_v25 = vadd.f32 %v425_v18, %v114_v17  ;;  %v140_v45 = vmax.f32 %v130_v37, 0.0 }
  0xa6   :  { %v590_v31 = vmax.f32 %v115_v25, 0.0  ;;  %v610_v50 = vsel %vm159_vm1, %v140_v45, 0.0  ;;  %v287_v45 = vld [vmem:[#allocation2 + $0x18] sm:$0xff] }
  0xa8   :  { %v189_v38 = vadd.f32 %v188_v34, %v590_v31 }
  0xab   :  { %v117_v23 = vpop.f32.mrf.mxu0 }
  0xac   :  { %v118_v29 = vadd.f32 %v425_v18, %v117_v23 }
  0xae   :  { %v593_v35 = vmax.f32 %v118_v29, 0.0  ;;  %v293_v29 = vld [vmem:[#allocation2 + $0x48] sm:$0xff] }
  0xaf   :  { %310 = vmatpush.msra.mxu1 %v293_v29  ;;  %401 = vmatpush.msra.mxu2 %v293_v29 }
  0xb0   :  { %v190_v42 = vadd.f32 %v189_v38, %v593_v35  ;;  %402 = vmatpush.msrb.mxu3 %v293_v29  ;;  %v290_v38 = vld [vmem:[#allocation2 + $0x30] sm:$0xff] }
  0xb1   :  { %311 = vmatpush.msra.mxu1 %v292_v33  ;;  %403 = vmatpush.msra.mxu2 %v292_v33 }
  0xb2   :  { %404 = vmatpush.msrb.mxu3 %v292_v33 }
  0xb3   :  { %v120_v36 = vpop.f32.mrf.mxu0 }
  0xb4   :  { %v121_v40 = vadd.f32 %v425_v18, %v120_v36  ;;  %v291_v36 = vld [vmem:[#allocation2 + $0x38] sm:$0xff] }
  0xb5   :  { %312 = vmatpush.msra.mxu1 %v291_v36  ;;  %405 = vmatpush.msra.mxu2 %v291_v36 }
  0xb6   :  { %v599_v44 = vmax.f32 %v121_v40, 0.0  ;;  %406 = vmatpush.msrb.mxu3 %v291_v36  ;;  %v289_v40 = vld [vmem:[#allocation2 + $0x28] sm:$0xff] }
  0xb7   :  { %313 = vmatpush.msra.mxu1 %v290_v38  ;;  %407 = vmatpush.msra.mxu2 %v290_v38 }
  0xb8   :  { %v191_v47 = vadd.f32 %v190_v42, %v599_v44  ;;  %408 = vmatpush.msrb.mxu3 %v290_v38  ;;  %v288_v42 = vld [vmem:[#allocation2 + $0x20] sm:$0xff] }
  0xb9   :  { %314 = vmatpush.msra.mxu1 %v289_v40  ;;  %409 = vmatpush.msra.mxu2 %v289_v40 }
  0xba   :  { %v192_v49 = vadd.f32 %v191_v47, %v601_v46  ;;  %410 = vmatpush.msrb.mxu3 %v289_v40 }
  0xbb   :  { %315 = vmatpush.msra.mxu1 %v288_v42  ;;  %411 = vmatpush.msra.mxu2 %v288_v42 }
  0xbc   :  { %v193_v51 = vadd.f32 %v192_v49, %v605_v48  ;;  %412 = vmatpush.msrb.mxu3 %v288_v42  ;;  %v286_v49 = vld [vmem:[#allocation2 + $0x10] sm:$0xff] }
  0xbd   :  { %316 = vmatpush.msra.mxu1 %v287_v45  ;;  %413 = vmatpush.msra.mxu2 %v287_v45 }
  0xbe   :  { %v194_v52 = vadd.f32 %v193_v51, %v610_v50  ;;  %414 = vmatpush.msrb.mxu3 %v287_v45  ;;  %v285_v51 = vld [vmem:[#allocation2 + $0x8] sm:$0xff] }
  0xbf   :  { %317 = vmatpush.msra.mxu1 %v286_v49  ;;  %415 = vmatpush.msra.mxu2 %v286_v49 }
  0xc0   :  { %v195_v53 = vrot.slane %v194_v52, 4  ;;  %416 = vmatpush.msrb.mxu3 %v286_v49 }
  0xc1   :  { %318 = vmatpush.msra.mxu1 %v285_v51  ;;  %417 = vmatpush.msra.mxu2 %v285_v51 }
  0xc2   :  { %v196_v54 = vadd.f32 %v195_v53, %v194_v52  ;;  %v284_v53 = vld [vmem:[#allocation2] sm:$0xff]  ;;  %418 = vmatpush.msrb.mxu3 %v285_v51 }
  0xc3   :  { %319 = vmatpush.msra.mxu1 %v284_v53  ;;  %419 = vmatpush.msra.mxu2 %v284_v53 }
  0xc4   :  { %v197_v55 = vrot.slane %v196_v54, 2  ;;  %420 = vmatpush.msrb.mxu3 %v284_v53 }
  0xc6   :  { %v198_v56 = vadd.f32 %v197_v55, %v196_v54 }
  0xc8   :  { %v199_v57 = vrot.slane %v198_v56, 1 }
  0xca   :  { %v200_v58 = vadd.f32 %v199_v57, %v198_v56 }
  0xcc   :  { %v614_v59 = vmul.f32 0.014285714, %v200_v58 }
  0xce   :  { %v202_v60 = vsub.f32 %v584_v27, %v614_v59  ;;  %v203_v61 = vsub.f32 %v582_v24, %v614_v59  ;;  %v204_v62 = vsub.f32 %v586_v28, %v614_v59  ;;  %v205_v63 = vsub.f32 %v590_v31, %v614_v59 }
  0xcf   :  { %v206_v3 = vsub.f32 %v593_v35, %v614_v59  ;;  %v207_v7 = vsub.f32 %v599_v44, %v614_v59  ;;  %v208_v11 = vsub.f32 %v601_v46, %v614_v59  ;;  %v210_v15 = vsub.f32 %v610_v50, %v614_v59 }
  0xd0   :  { %v220_v0 = vmul.f32 %v202_v60, %v202_v60  ;;  %v221_v1 = vmul.f32 %v203_v61, %v203_v61  ;;  %v222_v4 = vmul.f32 %v204_v62, %v204_v62  ;;  %v223_v8 = vmul.f32 %v205_v63, %v205_v63  ;;  %v255_v63 = vld [vmem:[%s664_s3] sm:$0x1] }
  0xd1   :  { %v224_v12 = vmul.f32 %v206_v3, %v206_v3  ;;  %v209_v16 = vsub.f32 %v605_v48, %v614_v59  ;;  %v225_v17 = vmul.f32 %v207_v7, %v207_v7  ;;  %v226_v20 = vmul.f32 %v208_v11, %v208_v11 }
  0xd2   :  { %v229_v5 = vadd.f32 %v221_v1, %v220_v0  ;;  %v219_v23 = vsel %vm159_vm1, %v210_v15, 0.0 }
  0xd3   :  { %v227_v25 = vmul.f32 %v209_v16, %v209_v16  ;;  %v228_v30 = vmul.f32 %v219_v23, %v219_v23 }
  0xd4   :  { %v230_v9 = vadd.f32 %v229_v5, %v222_v4 }
  0xd6   :  { %v231_v13 = vadd.f32 %v230_v9, %v223_v8 }
  0xd8   :  { %v232_v18 = vadd.f32 %v231_v13, %v224_v12 }
  0xda   :  { %v233_v21 = vadd.f32 %v232_v18, %v225_v17 }
  0xdc   :  { %v234_v26 = vadd.f32 %v233_v21, %v226_v20 }
  0xde   :  { %v235_v32 = vadd.f32 %v234_v26, %v227_v25 }
  0xe0   :  { %v236_v34 = vadd.f32 %v235_v32, %v228_v30 }
  0xe2   :  { %v237_v37 = vrot.slane %v236_v34, 4 }
  0xe4   :  { %v238_v39 = vadd.f32 %v237_v37, %v236_v34 }
  0xe6   :  { %v239_v41 = vrot.slane %v238_v39, 2 }
  0xe8   :  { %v240_v43 = vadd.f32 %v239_v41, %v238_v39 }
  0xea   :  { %v241_v47 = vrot.slane %v240_v43, 1 }
  0xec   :  { %v242_v52 = vadd.f32 %v241_v47, %v240_v43 }
  0xee   :  { %v243_v54 = vmul.f32 0.014285714, %v242_v52 }
  0xf0   :  { %v244_v55 = vadd.f32 1e-05, %v243_v54 }
  0xf2   :  { %427 = vrsqrt.f32 %v244_v55  ;;  %vm251_vm3 = vweird.f32 %v244_v55 }
  0xf8   :  { %v428_v56 = vpop.eup %427 }
  0xf9   :  { %v246_v57 = vmul.f32 %v428_v56, %v244_v55  ;;  %vm252_vm2 = vweird.f32 %v428_v56 }
  0xfa   :  { %vm253_vm4 = vmor %vm251_vm3, %vm252_vm2 }
  0xfb   :  { %v247_v58 = vmul.f32 %v428_v56, %v246_v57 }
  0xfd   :  { %v248_v60 = vmul.f32 0.5, %v247_v58 }
  0xff   :  { %v249_v61 = vsub.f32 1.5, %v248_v60 }
 0x101   :  { %v250_v62 = vmul.f32 %v428_v56, %v249_v61 }
 0x103   :  { %v254_v0 = vsel %vm253_vm4, %v428_v56, %v250_v62 }
 0x104   :  { %v256_v1 = vmul.f32 %v255_v63, %v254_v0 }
 0x106   :  { %v258_v3 = vmul.f32 %v256_v1, %v614_v59  ;;  %v261_v4 = vperm.slane %v256_v1, 0 }
 0x108   :  { %v259_v5 = vsub.f32 %v257_v2, %v258_v3  ;;  %v263_v7 = vmul.f32 %v261_v4, %v584_v27  ;;  %v266_v8 = vmul.f32 %v261_v4, %v590_v31  ;;  %v270_v9 = vmul.f32 %v261_v4, %v605_v48 }
 0x109   :  { %v264_v13 = vmul.f32 %v261_v4, %v582_v24  ;;  %v267_v14 = vmul.f32 %v261_v4, %v593_v35  ;;  %v271_v59 = vmul.f32 %v261_v4, %v610_v50  ;;  %v265_v27 = vmul.f32 %v261_v4, %v586_v28  ;;  %v426_v35 = vld [vmem:[%s667_s6] ss:$0 sm:$0xff]  ;;  %s484_s6 = smov [#allocation5]  }
 0x10a   :  { %v273_v6 = vperm.slane %v259_v5, 0  ;;  %v268_v31 = vmul.f32 %v261_v4, %v599_v44  ;;  %v269_v24 = vmul.f32 %v261_v4, %v601_v46  ;;  %s361_s14 = sshll.u32 %s484_s6, 4  ;;  %s362_s14 = int_to_ptr.vmem [resolvable:$true] %s361_s14 }
 0x10c   :  { %v275_v10 = vadd.f32 %v273_v6, %v263_v7  ;;  %v278_v11 = vadd.f32 %v273_v6, %v266_v8  ;;  %v282_v12 = vadd.f32 %v273_v6, %v270_v9  ;;  %v276_v15 = vadd.f32 %v273_v6, %v264_v13 }
 0x10d   :  { %v279_v16 = vadd.f32 %v273_v6, %v267_v14  ;;  %v283_v17 = vadd.f32 %v273_v6, %v271_v59  ;;  %v277_v48 = vadd.f32 %v273_v6, %v265_v27  ;;  %v280_v18 = vadd.f32 %v273_v6, %v268_v31 }
 0x10e   :  { %320 = vmatmul.f32.vlgmr.msra.gmra.mxu1 %v275_v10  ;;  %329 = vmatmul.f32.vlgmr.msra.gmra.mxu2 %v278_v11  ;;  %v281_v19 = vadd.f32 %v273_v6, %v269_v24 }
 0x10f   :  { %341 = vmatmul.f32.vlgmr.msrb.gmra.mxu3 %v282_v12 }
 0x116   :  { %323 = vmatmul.f32.gmra.mxu1 %v276_v15  ;;  %332 = vmatmul.f32.gmra.mxu2 %v279_v16 }
 0x117   :  { %344 = vmatmul.f32.gmra.mxu3 %v283_v17 }
 0x11e   :  { %326 = vmatmul.f32.gmra.mxu1 %v277_v48  ;;  %335 = vmatmul.f32.gmra.mxu2 %v280_v18 }
 0x126   :  { %338 = vmatmul.f32.gmra.mxu2 %v281_v19 }
 0x18b   :  { %v321_v50 = vpop.f32.mrf.mxu1 }
 0x18c   :  { %v322_v20 = vadd.f32 %v426_v35, %v321_v50 }
 0x18e   :  { %348 = vst [vmem:[#allocation5] sm:$0xff] %v322_v20 }
 0x191   :  { %v330_v21 = vpop.f32.mrf.mxu2 }
 0x192   :  { %v331_v22 = vadd.f32 %v426_v35, %v330_v21  ;;  %v342_v28 = vpop.f32.mrf.mxu3 }
 0x193   :  { %v343_v23 = vadd.f32 %v426_v35, %v342_v28  ;;  %v324_v44 = vpop.f32.mrf.mxu1 }
 0x194   :  { %351 = vst [vmem:[#allocation5 + $0x18] sm:$0xff] %v331_v22  ;;  %v325_v25 = vadd.f32 %v426_v35, %v324_v44 }
 0x195   :  { %355 = vst [vmem:[#allocation5 + $0x38] sm:$0xff] %v343_v23 }
 0x196   :  { %349 = vst [vmem:[#allocation5 + $0x8] sm:$0xff] %v325_v25 }
 0x199   :  { %v333_v26 = vpop.f32.mrf.mxu2 }
 0x19a   :  { %v334_v46 = vadd.f32 %v426_v35, %v333_v26  ;;  %v345_v29 = vpop.f32.mrf.mxu3 }
 0x19b   :  { %v346_v30 = vadd.f32 %v426_v35, %v345_v29  ;;  %v327_v32 = vpop.f32.mrf.mxu1 }
 0x19c   :  { %352 = vst [vmem:[#allocation5 + $0x20] sm:$0xff] %v334_v46  ;;  %v328_v33 = vadd.f32 %v426_v35, %v327_v32 }
 0x19d   :  { %356 = vst [vmem:[#allocation5 + $0x40] sm:$0xff] %v346_v30 }
 0x19e   :  { %350 = vst [vmem:[#allocation5 + $0x10] sm:$0xff] %v328_v33 }
 0x1a1   :  { %v336_v34 = vpop.f32.mrf.mxu2 }
 0x1a2   :  { %v337_v36 = vadd.f32 %v426_v35, %v336_v34 }
 0x1a4   :  { %353 = vst [vmem:[#allocation5 + $0x28] sm:$0xff] %v337_v36 }
 0x1a9   :  { %v339_v37 = vpop.f32.mrf.mxu2 }
 0x1aa   :  { %v340_v38 = vadd.f32 %v426_v35, %v339_v37 }
 0x1ac   :  { %354 = vst [vmem:[#allocation5 + $0x30] sm:$0xff] %v340_v38 }
 0x1ad   :  { %369 = dma.vmem_to_hbm [thread:$0]  %s362_s14, 1152, %s364_s17, [#allocation4], %s482_s29, %s482_s29, %s483_s30  }
 0x1ae   :  { %479 = dma.done.wait [#allocation4], 1152  }
 0x1af   :  { %480 = vsyncadd [#allocation4], 4294966144 }
 0x1b0   :  { %374 = vsyncpa [#allocation3], 1 }
 0x1b1   :  { %375 = vsyncpa [#allocation4], 1 }

</bundles_post_ra>
